<compile_context>
chip_gen: v7x
topology: tpu7x:2x2x1
jax: 0.10.0
libtpu: 0.0.40
codegen_flags: <defaults>
</compile_context>

<pallas_src>
import functools

import jax
import jax.numpy as jnp
from jax.experimental import pallas as pl
from jax.experimental.pallas import tpu as pltpu

_LANES = 128
_SUBLANES = 8
_MAX_BLOCK_ROWS = 2048  # 2048*128*4B = 1 MiB per input block.


def _focal_loss_kernel(x_ref, t_ref, out_ref, acc_ref, *, alpha, gamma,
                       n_total, block_rows, mask_tail):
    i = pl.program_id(0)

    @pl.when(i == 0)
    def _():
        acc_ref[...] = jnp.zeros_like(acc_ref)

    x = x_ref[...].astype(jnp.float32)
    t = t_ref[...].astype(jnp.float32)

    # Stable BCE-with-logits, elementwise (VPU + 3 EUP transcendentals).
    bce = jnp.maximum(x, 0.0) - x * t + jnp.log1p(jnp.exp(-jnp.abs(x)))
    pt = jnp.exp(-bce)
    one_minus_pt = 1.0 - pt
    if gamma == 2.0:
        modulator = one_minus_pt * one_minus_pt          # no float pow
    elif float(gamma).is_integer() and gamma >= 0:
        modulator = one_minus_pt ** int(gamma)           # repeated multiply
    else:
        modulator = one_minus_pt ** gamma
    focal = alpha * modulator * bce

    if mask_tail:
        # Zero out padded / out-of-bounds tail elements of the last block.
        row = jax.lax.broadcasted_iota(jnp.int32, focal.shape, 0)
        lane = jax.lax.broadcasted_iota(jnp.int32, focal.shape, 1)
        gidx = (i * block_rows + row) * _LANES + lane
        focal = jnp.where(gidx < n_total, focal, 0.0)

    # Resident vector accumulator: pure VPU adds per grid step.
    acc_ref[...] += focal

    @pl.when(i == pl.num_programs(0) - 1)
    def _():
        out_ref[0, 0] = jnp.sum(acc_ref[...]) / jnp.float32(n_total)


def focal_loss(inputs, targets, alpha=0.25, gamma=2.0):
    """Pallas focal loss. inputs/targets: same shape, any rank/dtype."""
    assert inputs.shape == targets.shape
    n_total = inputs.size

    x = inputs.reshape(-1)
    t = targets.reshape(-1)

    # Pad the flat length to a multiple of 8*128 only when needed; the tail
    # is masked in-kernel so no analytic correction is required.
    tile = _SUBLANES * _LANES
    pad = (-n_total) % tile
    if pad:
        x = jnp.pad(x, (0, pad))
        t = jnp.pad(t, (0, pad))
    rows = (n_total + pad) // _LANES          # multiple of 8
    x2 = x.reshape(rows, _LANES)
    t2 = t.reshape(rows, _LANES)

    block_rows = min(_MAX_BLOCK_ROWS, rows)
    grid = (pl.cdiv(rows, block_rows),)
    mask_tail = (pad != 0) or (rows % block_rows != 0)

    kernel = functools.partial(
        _focal_loss_kernel, alpha=alpha, gamma=gamma, n_total=n_total,
        block_rows=block_rows, mask_tail=mask_tail)

    out = pl.pallas_call(
        kernel,
        out_shape=jax.ShapeDtypeStruct((1, 1), jnp.float32),
        grid_spec=pltpu.PrefetchScalarGridSpec(
            num_scalar_prefetch=0,
            grid=grid,
            in_specs=[
                pl.BlockSpec((block_rows, _LANES), lambda i: (i, 0)),
                pl.BlockSpec((block_rows, _LANES), lambda i: (i, 0)),
            ],
            out_specs=pl.BlockSpec((1, 1), lambda i: (0, 0),
                                   memory_space=pltpu.SMEM),
            scratch_shapes=[pltpu.VMEM((block_rows, _LANES), jnp.float32)],
        ),
        # Single reduction axis -> 'arbitrary'.
        # TODO(synk): on v7x, add a leading size-2 'parallel' axis with
        # per-core partial sums (out shape (2,1)) to use both TensorCores.
        compiler_params=pltpu.CompilerParams(
            dimension_semantics=("arbitrary",)),
    )(x2, t2)

    return out[0, 0]


def focal_loss_ref(inputs, targets, alpha=0.25, gamma=2.0):
    x = inputs.astype(jnp.float32)
    t = targets.astype(jnp.float32)
    bce = jnp.maximum(x, 0.0) - x * t + jnp.log1p(jnp.exp(-jnp.abs(x)))
    pt = jnp.exp(-bce)
    return jnp.mean(alpha * (1.0 - pt) ** gamma * bce)


if __name__ == "__main__":
    key = jax.random.PRNGKey(0)
    k1, k2 = jax.random.split(key)

    # Shapes consistent with an image-model head: per-pixel binary logits.
    inputs = jax.random.normal(k1, (2, 4, 16, 16), dtype=jnp.float32) * 2.0
    targets = (
        jax.random.uniform(k2, (2, 4, 16, 16), dtype=jnp.float32) > 0.7
    ).astype(jnp.float32)

    loss = jax.block_until_ready(focal_loss(inputs, targets))
    ref = focal_loss_ref(inputs, targets)
    assert jnp.allclose(loss, ref, rtol=1e-5, atol=1e-6), (loss, ref)

    # Ragged total (3*5*7*11 = 1155 elements) exercises the in-kernel
    # tail-masking path.
    i2 = jax.random.normal(k1, (3, 5, 7, 11), dtype=jnp.float32)
    t2 = (jax.random.uniform(k2, (3, 5, 7, 11)) > 0.5).astype(jnp.float32)
    loss2 = jax.block_until_ready(focal_loss(i2, t2))
    ref2 = focal_loss_ref(i2, t2)
    assert jnp.allclose(loss2, ref2, rtol=1e-5, atol=1e-6), (loss2, ref2)

    print("KERNEL_OK")
</pallas_src>

<mosaic_0001>
module attributes {stable_mosaic.version = 11 : i64} {
  func.func @_focal_loss_kernel(%arg0: i32, %arg1: memref<16x128xf32, #tpu.memory_space<vmem>>, %arg2: memref<16x128xf32, #tpu.memory_space<vmem>>, %arg3: memref<1x1xf32, #tpu.memory_space<smem>>, %arg4: memref<16x128xf32, #tpu.memory_space<vmem>>) attributes {dimension_semantics = [#tpu.dimension_semantics<arbitrary>], iteration_bounds = array<i64: 1>, scalar_prefetch = 0 : i64, scratch_operands = 1 : i64, tpu.core_type = #tpu.core_type<tc>, window_params = [{transform_indices = @transform_0, window_bounds = array<i64: 16, 128>}, {transform_indices = @transform_1, window_bounds = array<i64: 16, 128>}, {transform_indices = @transform_2, window_bounds = array<i64: 1, 1>}]} {
    %c0_i32 = arith.constant 0 : i32
    %0 = arith.cmpi eq, %arg0, %c0_i32 : i32
    %1 = arith.extui %0 : i1 to i32
    %c0_i32_0 = arith.constant 0 : i32
    %2 = arith.cmpi ne, %1, %c0_i32_0 : i32
    scf.if %2 {
      %cst_14 = arith.constant 0.000000e+00 : f32
      %30 = vector.broadcast %cst_14 : f32 to vector<16x128xf32>
      %c0_15 = arith.constant 0 : index
      %c0_16 = arith.constant 0 : index
      %31 = vector.load %arg4[%c0_15, %c0_16] : memref<16x128xf32, #tpu.memory_space<vmem>>, vector<16x128xf32>
      tpu.vector_store %arg4[%c0_15, %c0_16], %30 {strides = array<i32>} : memref<16x128xf32, #tpu.memory_space<vmem>>, vector<16x128xf32>,
    } else {
    }
    %c0 = arith.constant 0 : index
    %c0_1 = arith.constant 0 : index
    %3 = vector.load %arg1[%c0, %c0_1] : memref<16x128xf32, #tpu.memory_space<vmem>>, vector<16x128xf32>
    %c0_2 = arith.constant 0 : index
    %c0_3 = arith.constant 0 : index
    %4 = vector.load %arg2[%c0_2, %c0_3] : memref<16x128xf32, #tpu.memory_space<vmem>>, vector<16x128xf32>
    %cst = arith.constant 0.000000e+00 : f32
    %5 = vector.broadcast %cst : f32 to vector<16x128xf32>
    %6 = arith.maximumf %3, %5 : vector<16x128xf32>
    %7 = arith.mulf %3, %4 : vector<16x128xf32>
    %8 = arith.subf %6, %7 : vector<16x128xf32>
    %9 = math.absf %3 : vector<16x128xf32>
    %cst_4 = arith.constant 0.000000e+00 : f32
    %10 = vector.broadcast %cst_4 : f32 to vector<16x128xf32>
    %11 = arith.subf %10, %9 : vector<16x128xf32>
    %12 = math.exp %11 : vector<16x128xf32>
    %13 = math.log1p %12 : vector<16x128xf32>
    %14 = arith.addf %8, %13 : vector<16x128xf32>
    %cst_5 = arith.constant 0.000000e+00 : f32
    %15 = vector.broadcast %cst_5 : f32 to vector<16x128xf32>
    %16 = arith.subf %15, %14 : vector<16x128xf32>
    %17 = math.exp %16 : vector<16x128xf32>
    %cst_6 = arith.constant 1.000000e+00 : f32
    %18 = vector.broadcast %cst_6 : f32 to vector<16x128xf32>
    %19 = arith.subf %18, %17 : vector<16x128xf32>
    %20 = arith.mulf %19, %19 : vector<16x128xf32>
    %cst_7 = arith.constant 2.500000e-01 : f32
    %21 = vector.broadcast %cst_7 : f32 to vector<16x128xf32>
    %22 = arith.mulf %21, %20 : vector<16x128xf32>
    %23 = arith.mulf %22, %14 : vector<16x128xf32>
    %c0_8 = arith.constant 0 : index
    %c0_9 = arith.constant 0 : index
    %24 = vector.load %arg4[%c0_8, %c0_9] : memref<16x128xf32, #tpu.memory_space<vmem>>, vector<16x128xf32>
    %25 = arith.addf %24, %23 : vector<16x128xf32>
    %c0_10 = arith.constant 0 : index
    %c0_11 = arith.constant 0 : index
    %26 = vector.load %arg4[%c0_10, %c0_11] : memref<16x128xf32, #tpu.memory_space<vmem>>, vector<16x128xf32>
    tpu.vector_store %arg4[%c0_10, %c0_11], %25 {strides = array<i32>} : memref<16x128xf32, #tpu.memory_space<vmem>>, vector<16x128xf32>,
    %c0_i32_12 = arith.constant 0 : i32
    %27 = arith.cmpi eq, %arg0, %c0_i32_12 : i32
    %28 = arith.extui %27 : i1 to i32
    %c0_i32_13 = arith.constant 0 : i32
    %29 = arith.cmpi ne, %28, %c0_i32_13 : i32
    scf.if %29 {
      %c0_14 = arith.constant 0 : index
      %c0_15 = arith.constant 0 : index
      %30 = vector.load %arg4[%c0_14, %c0_15] : memref<16x128xf32, #tpu.memory_space<vmem>>, vector<16x128xf32>
      %31 = vector.shape_cast %30 : vector<16x128xf32> to vector<1x16x128xf32>
      %cst_16 = arith.constant dense<0.000000e+00> : vector<1xf32>
      %32 = vector.multi_reduction <add>, %31, %cst_16 [1, 2] : vector<1x16x128xf32> to vector<1xf32>
      %33 = vector.shape_cast %32 : vector<1xf32> to vector<1x1x1xf32>
      %34 = vector.extract %33[0, 0, 0] : f32 from vector<1x1x1xf32>
      %cst_17 = arith.constant 2.048000e+03 : f32
      %35 = arith.divf %34, %cst_17 : f32
      %c0_18 = arith.constant 0 : index
      %c0_19 = arith.constant 0 : index
      %36 = memref.load %arg3[%c0_18, %c0_19] : memref<1x1xf32, #tpu.memory_space<smem>>
      memref.store %35, %arg3[%c0_18, %c0_19] : memref<1x1xf32, #tpu.memory_space<smem>>
    } else {
    }
    return
  }
  func.func @transform_0(%arg0: i32) -> (i32, i32) {
    %c0_i32 = arith.constant 0 : i32
    %c0_i32_0 = arith.constant 0 : i32
    return %arg0, %c0_i32 : i32, i32
  }
  func.func @transform_1(%arg0: i32) -> (i32, i32) {
    %c0_i32 = arith.constant 0 : i32
    %c0_i32_0 = arith.constant 0 : i32
    return %arg0, %c0_i32 : i32, i32
  }
  func.func @transform_2(%arg0: i32) -> (i32, i32) {
    %c0_i32 = arith.constant 0 : i32
    %c0_i32_0 = arith.constant 0 : i32
    %c0_i32_1 = arith.constant 0 : i32
    return %c0_i32, %c0_i32_0 : i32, i32
  }
}

</mosaic_0001>

<bundles_post_ra>
// kernel: tpu_custom_call.1
= control target key start
LH: loop header
LB: loop body
LE: loop exit
PB: predicated region body
PF: predicated region fallthrough
CT: control target
= control target key end

     0   :  { %7 = vsyncpa [#allocation4], 0  ;;  %s274_s0 = inlined_call_operand.hbm [shape: f32[16,128], index: 0, kind: input, shape index: {}]   ;;  %s275_s1 = inlined_call_operand.hbm [shape: f32[16,128], index: 1, kind: input, shape index: {}]   ;;  %s276_s2 = inlined_call_operand.hbm [shape: f32[1,1], index: 2, kind: output, shape index: {}]  }
   0x1   :  { %8 = vsyncpa [#allocation7], 0 }
   0x2   :  { %9 = vsyncpa [#allocation5], 0  ;;  %s218_s9 = smov [#allocation3]   ;;  %s158_s13 = scalar_lea.hbm %s274_s0, 256 }
   0x3   :  { %s15_s10 = sshll.u32 %s218_s9, 4  ;;  %p159_p0 = scmp.ne.s32.totalorder %s274_s0, %s158_s13  ;;  %s16_s10 = int_to_ptr.vmem [resolvable:$true] %s15_s10 }
   0x4   :  { %p162_p1 = scmp.lt.u32.totalorder %s158_s13, %s274_s0 }
   0x6   :  { %p164_p2 = pnand %p162_p1, %p159_p0 }
   0x8   :  { %167 = shalt.err (!%p164_p2)
}
   0x9   :  { %s168_s18 = scalar_lea.vmem %s16_s10, 256  ;;  %p173_p4 = scmp.lt.s32.totalorder %s16_s10, %s16_s10 }
   0xa   :  { %p169_p3 = scmp.ne.s32.totalorder %s16_s10, %s168_s18  ;;  %p174_p5 = scmp.lt.s32.totalorder %s168_s18, %s168_s18 }
   0xc   :  { %p175_p6 = por %p174_p5, %p173_p4 }
   0xe   :  { %p176_p7 = pnand %p175_p6, %p169_p3 }
  0x10   :  { %179 = shalt.err (!%p176_p7)
}
  0x11   :  { %s219_s19 = smov 128   ;;  %s220_s20 = smov 8  }
  0x12   :  { %21 = dma.hbm_to_vmem [thread:$0]  %s274_s0, 256, %s16_s10, [#allocation4], %s219_s19, %s219_s19, %s220_s20  }
  0x13   :  { %s221_s23 = smov [#allocation6]   ;;  %s180_s27 = scalar_lea.hbm %s275_s1, 256 }
  0x14   :  { %s27_s24 = sshll.u32 %s221_s23, 4  ;;  %p181_p8 = scmp.ne.s32.totalorder %s275_s1, %s180_s27  ;;  %s28_s24 = int_to_ptr.vmem [resolvable:$true] %s27_s24 }
  0x15   :  { %p184_p9 = scmp.lt.u32.totalorder %s180_s27, %s275_s1 }
  0x17   :  { %p186_p10 = pnand %p184_p9, %p181_p8 }
  0x19   :  { %189 = shalt.err (!%p186_p10)
}
  0x1a   :  { %s190_s4 = scalar_lea.vmem %s28_s24, 256  ;;  %p195_p12 = scmp.lt.s32.totalorder %s28_s24, %s28_s24 }
  0x1b   :  { %p191_p11 = scmp.ne.s32.totalorder %s28_s24, %s190_s4  ;;  %p196_p13 = scmp.lt.s32.totalorder %s190_s4, %s190_s4 }
  0x1d   :  { %p197_p0 = por %p196_p13, %p195_p12 }
  0x1f   :  { %p198_p1 = pnand %p197_p0, %p191_p11 }
  0x21   :  { %201 = shalt.err (!%p198_p1)
}
  0x22   :  { %33 = dma.hbm_to_vmem [thread:$0]  %s275_s1, 256, %s28_s24, [#allocation7], %s219_s19, %s219_s19, %s220_s20  }
  0x23   :  { %212 = dma.done.wait [#allocation4], 256  }
  0x24   :  { %213 = vsyncadd [#allocation4], 4294967040 }
  0x25   :  { %214 = dma.done.wait [#allocation7], 256  }
  0x26   :  { %215 = vsyncadd [#allocation7], 4294967040  ;;  %v46_v0 = vld [vmem:[#allocation3] sm:$0xff]  ;;  %v47_v1 = vld [vmem:[#allocation3 + $0x8] sm:$0xff]  ;;  %s202_s9 = scalar_lea.hbm %s276_s2, 16 }
  0x27   :  { %v56_v2 = vand.u32 2147483647, %v46_v0  ;;  %v57_v3 = vand.u32 2147483647, %v47_v1  ;;  %v48_v14 = vld [vmem:[#allocation6] sm:$0xff]  ;;  %v49_v15 = vld [vmem:[#allocation6 + $0x8] sm:$0xff]  ;;  %p203_p2 = scmp.ne.s32.totalorder %s276_s2, %s202_s9  ;;  %p206_p3 = scmp.lt.u32.totalorder %s202_s9, %s276_s2 }
  0x28   :  { %v50_v17 = vmax.f32 %v46_v0, 0.0  ;;  %v52_v18 = vmul.f32 %v48_v14, %v46_v0  ;;  %v51_v21 = vmax.f32 %v47_v1, 0.0  ;;  %v53_v22 = vmul.f32 %v49_v15, %v47_v1 }
  0x29   :  { %v58_v4 = vsub.f32 0.0, %v56_v2  ;;  %v59_v5 = vsub.f32 0.0, %v57_v3  ;;  %p208_p4 = pnand %p206_p3, %p203_p2 }
  0x2a   :  { %v54_v26 = vsub.f32 %v50_v17, %v52_v18  ;;  %v55_v29 = vsub.f32 %v51_v21, %v53_v22 }
  0x2b   :  { %v60_v6 = vmul.f32 1.442695, %v58_v4  ;;  %v62_v7 = vmul.f32 1.442695, %v59_v5 }
  0x2d   :  { %146 = vpow2.f32 %v60_v6 }
  0x2e   :  { %148 = vpow2.f32 %v62_v7 }
  0x37   :  { %v147_v8 = vpop.eup %146 }
  0x38   :  { %v149_v9 = vpop.eup %148  ;;  %v64_v10 = vadd.f32 1.0, %v147_v8  ;;  %v67_v12 = vmul.f32 -0.5, %v147_v8  ;;  %v70_v19 = vand.u32 2147483647, %v147_v8 }
  0x39   :  { %v73_v11 = vadd.f32 1.0, %v149_v9  ;;  %v76_v13 = vmul.f32 -0.5, %v149_v9  ;;  %v79_v23 = vand.u32 2147483647, %v149_v9 }
  0x3a   :  { %150 = vlog2.f32 %v64_v10  ;;  %v68_v16 = vadd.f32 1.0, %v67_v12  ;;  %vm71_vm0 = vcmp.lt.f32.partialorder %v70_v19, 0.0004427343 }
  0x3b   :  { %152 = vlog2.f32 %v73_v11  ;;  %v77_v20 = vadd.f32 1.0, %v76_v13  ;;  %vm80_vm1 = vcmp.lt.f32.partialorder %v79_v23, 0.0004427343 }
  0x3c   :  { %v69_v24 = vmul.f32 %v147_v8, %v68_v16 }
  0x3d   :  { %v78_v27 = vmul.f32 %v149_v9, %v77_v20 }
  0x44   :  { %v151_v25 = vpop.eup %150 }
  0x45   :  { %v153_v28 = vpop.eup %152  ;;  %v66_v30 = vmul.f32 0.6931472, %v151_v25 }
  0x46   :  { %v75_v31 = vmul.f32 0.6931472, %v153_v28 }
  0x47   :  { %v72_v32 = vsel %vm71_vm0, %v69_v24, %v66_v30 }
  0x48   :  { %v81_v33 = vsel %vm80_vm1, %v78_v27, %v75_v31  ;;  %v82_v34 = vadd.f32 %v72_v32, %v54_v26 }
  0x49   :  { %v83_v35 = vadd.f32 %v81_v33, %v55_v29 }
  0x4a   :  { %v84_v36 = vsub.f32 0.0, %v82_v34 }
  0x4b   :  { %v85_v37 = vsub.f32 0.0, %v83_v35 }
  0x4c   :  { %v86_v38 = vmul.f32 1.442695, %v84_v36 }
  0x4d   :  { %v88_v39 = vmul.f32 1.442695, %v85_v37 }
  0x4e   :  { %154 = vpow2.f32 %v86_v38 }
  0x4f   :  { %156 = vpow2.f32 %v88_v39 }
  0x58   :  { %v155_v40 = vpop.eup %154 }
  0x59   :  { %v157_v41 = vpop.eup %156  ;;  %v90_v42 = vsub.f32 1.0, %v155_v40 }
  0x5a   :  { %v91_v43 = vsub.f32 1.0, %v157_v41 }
  0x5b   :  { %v92_v44 = vmul.f32 %v90_v42, %v90_v42 }
  0x5c   :  { %v93_v45 = vmul.f32 %v91_v43, %v91_v43 }
  0x5d   :  { %v94_v46 = vmul.f32 0.25, %v92_v44 }
  0x5e   :  { %v95_v47 = vmul.f32 0.25, %v93_v45 }
  0x5f   :  { %v96_v48 = vmul.f32 %v94_v46, %v82_v34 }
  0x60   :  { %v97_v49 = vmul.f32 %v95_v47, %v83_v35 }
  0x62   :  { %v109_v50 = vadd.f32 %v97_v49, %v96_v48 }
  0x64   :  { %110 = vadd.xlane.f32.xlu0 %v109_v50 }
  0xf1   :  { %v111_v51 = vpop.xlane.xlu0 %110 }
  0xf2   :  { %v112_v52 = vrot.slane %v111_v51, 4 }
  0xf4   :  { %v113_v53 = vadd.f32 %v112_v52, %v111_v51 }
  0xf6   :  { %v114_v54 = vrot.slane %v113_v53, 2 }
  0xf8   :  { %v115_v55 = vadd.f32 %v114_v54, %v113_v53 }
  0xfa   :  { %v116_v56 = vrot.slane %v115_v55, 1 }
  0xfc   :  { %v117_v57 = vadd.f32 %v116_v56, %v115_v55 }
  0xfe   :  { %139 = vpush %v117_v57 }
 0x12f   :  { %s140_s1 = spop %139 }
 0x130   :  { %s121_s6 = smul.f32 0.00048828125, %s140_s1 }
 0x132   :  { %123 = sst [smem:[#allocation8]] %s121_s6 }
 0x133   :  { %211 = shalt.err (!%p208_p4)
}
 0x134   :  { %s222_s14 = smov [#allocation8]  }
 0x135   :  { %131 = dma.smem_to_hbm %s222_s14, 16, %s276_s2, [#allocation5]  }
 0x136   :  { %216 = dma.done.wait [#allocation5], 16  }
 0x137   :  { %217 = vsyncadd [#allocation5], 4294967280 }
 0x138   :  { %135 = sfence }
 0x139   :  { %136 = vsyncpa [#allocation4], 1 }
 0x13a   :  { %137 = vsyncpa [#allocation7], 1 }
 0x13b   :  { %138 = vsyncpa [#allocation5], 1 }

</bundles_post_ra>
